<compile_context>
chip_gen: v5e
topology: v5e:2x2
jax: 0.10.0
libtpu: 0.0.40
codegen_flags: <defaults>
</compile_context>

<pallas_src>
import functools

import jax
import jax.numpy as jnp
from jax import lax
from jax.experimental import pallas as pl
from jax.experimental.pallas import tpu as pltpu

_LANES = 128
_SUBLANES = 8


def _blend_loss_kernel(scores_ref, labels_ref, totals_ref, counts_ref, *,
                       n_rows, row_tile):
    """One grid step: reduce a (row_tile, C) block to a (total, count) partial."""
    i = pl.program_id(0)

    s_nat = scores_ref[...]                                      # (TN, C) native dtype
    lbl = labels_ref[...]                                        # (TN, 1) int32

    # Ragged-tail mask by global row index: the last block may read past N; this also
    # neutralizes any garbage labels Pallas loads in that out-of-bounds region.
    row = lax.broadcasted_iota(jnp.int32, lbl.shape, 0)          # (TN, 1)
    in_bounds = (i * row_tile + row) < n_rows

    # Row max + label-gather select in native dtype (bf16 VPU on v6e/v7x); the cast to
    # f32 is exact and monotone, so LSE stability is preserved.
    m = jnp.max(s_nat, axis=-1, keepdims=True).astype(jnp.float32)       # (TN, 1)
    col = lax.broadcasted_iota(jnp.int32, s_nat.shape, 1)                # (TN, C)
    tgt = jnp.sum(jnp.where(col == lbl, s_nat, 0), axis=-1,
                  keepdims=True).astype(jnp.float32)                     # (TN, 1)

    # Numerically-stable log-sum-exp in f32.
    s = s_nat.astype(jnp.float32)
    lse = jnp.log(jnp.sum(jnp.exp(s - m), axis=-1, keepdims=True)) + m   # (TN, 1)

    # ignore_index = 0 (also drops the masked tail rows).
    valid = (lbl != 0) & in_bounds                                       # (TN, 1)
    per_row = jnp.where(valid, lse - tgt, 0.0)                           # (TN, 1)

    total = jnp.sum(per_row)                                             # f32 scalar
    count = jnp.sum(valid.astype(jnp.float32))                           # f32 scalar

    # Per-step partials, lane-dense unmasked stores (no carried dependency -> the row
    # axis can be "parallel" and v7x megacore splits it across both TensorCores).
    totals_ref[...] = jnp.broadcast_to(total, totals_ref.shape)
    counts_ref[...] = jnp.broadcast_to(count, counts_ref.shape)


def _pick_row_tile(n, c, itemsize, vmem_budget_bytes):
    """Row tile targeting ~2 MiB of scores per grid step within the VMEM budget.

    Budget counts the 2x double-buffered native-dtype scores input PLUS ~4 full-tile
    f32/i32 temporaries materialized in the body (f32 cast, iota, exp, select).
    """
    per_row_bytes = c * (2 * itemsize + 4 * 4)
    max_rows = max(_SUBLANES, vmem_budget_bytes // per_row_bytes)
    target_rows = pl.cdiv(2 << 20, c * itemsize)          # ~2 MiB of scores / step
    tn = min(max(n, _SUBLANES), max(target_rows, _SUBLANES), max_rows)
    return max(_SUBLANES, (int(tn) // _SUBLANES) * _SUBLANES)


def blend_loss(scores, labels, weight, *, row_tile=None, vmem_budget_bytes=32 << 20):
    """scores: (N, C) float, labels: (N,) int, weight: (L,) -> (L,) f32."""
    N, C = scores.shape
    itemsize = scores.dtype.itemsize

    if row_tile is None:
        row_tile = _pick_row_tile(N, C, itemsize, vmem_budget_bytes)
    row_tile = max(_SUBLANES, (int(row_tile) // _SUBLANES) * _SUBLANES)

    grid_n = pl.cdiv(N, row_tile)                 # ragged tail handled in-kernel
    labels_2d = labels.astype(jnp.int32).reshape(N, 1)   # tiny copy (N * 4 bytes)

    # Explicit VMEM limit derived from the real footprint (input double-buffer +
    # f32 temps + labels/outputs) with headroom; stays well under v7x's 64 MiB.
    footprint = row_tile * (C * (2 * itemsize + 4 * 4) + 16) + (1 << 20)
    vmem_limit = int(max(footprint + (8 << 20), 16 << 20))

    kernel = functools.partial(_blend_loss_kernel, n_rows=N, row_tile=row_tile)

    totals, counts = pl.pallas_call(
        kernel,
        out_shape=(
            jax.ShapeDtypeStruct((grid_n, _SUBLANES, _LANES), jnp.float32),
            jax.ShapeDtypeStruct((grid_n, _SUBLANES, _LANES), jnp.float32),
        ),
        grid_spec=pltpu.PrefetchScalarGridSpec(
            num_scalar_prefetch=0,
            grid=(grid_n,),
            in_specs=[
                pl.BlockSpec((row_tile, C), lambda i: (i, 0)),
                pl.BlockSpec((row_tile, 1), lambda i: (i, 0)),
            ],
            out_specs=(
                pl.BlockSpec((1, _SUBLANES, _LANES), lambda i: (i, 0, 0)),
                pl.BlockSpec((1, _SUBLANES, _LANES), lambda i: (i, 0, 0)),
            ),
        ),
        compiler_params=pltpu.CompilerParams(
            dimension_semantics=("parallel",),     # independent partials -> megacore
            vmem_limit_bytes=vmem_limit,
        ),
    )(scores, labels_2d)

    # O(grid_n) + O(L) epilogue in plain JAX (trivially cheap for XLA).
    total = jnp.sum(totals[:, 0, 0])
    count = jnp.sum(counts[:, 0, 0])
    ce = total / count                              # NaN if all labels == 0 (as torch)
    return weight.astype(jnp.float32) * ce


def blend_loss_ref(scores, labels, weight):
    """Pure-JAX reference of weight * CrossEntropyLoss(ignore_index=0)."""
    s = scores.astype(jnp.float32)
    logp = jax.nn.log_softmax(s, axis=-1)
    nll = -jnp.take_along_axis(logp, labels[:, None].astype(jnp.int32), axis=-1)[:, 0]
    valid = (labels != 0).astype(jnp.float32)
    ce = jnp.sum(nll * valid) / jnp.sum(valid)
    return weight.astype(jnp.float32) * ce


if __name__ == "__main__":
    key = jax.random.PRNGKey(0)
    k1, k2 = jax.random.split(key)

    # N deliberately not a multiple of the row tile to exercise the unpadded ragged tail.
    N, C, LENGTH = 20, 16, 4
    scores = jax.random.normal(k1, (N, C), dtype=jnp.float32)
    labels = jax.random.randint(k2, (N,), 0, C, dtype=jnp.int32)
    labels = labels.at[0].set(3)                 # guarantee at least one non-ignored label

    # nn.Parameter(torch.ones(length)) -> deterministic ones
    weight = jnp.ones((LENGTH,), dtype=jnp.float32)

    # f32 path, forced small tile (3 grid steps, ragged last block of 4 rows).
    out = blend_loss(scores, labels, weight, row_tile=8)
    jax.block_until_ready(out)
    ref = blend_loss_ref(scores, labels, weight)
    assert out.shape == (LENGTH,)
    assert jnp.allclose(out, ref, rtol=1e-5, atol=1e-5), (out, ref)

    # Auto tile sizing (single step here), same result.
    out_auto = blend_loss(scores, labels, weight)
    jax.block_until_ready(out_auto)
    assert jnp.allclose(out_auto, ref, rtol=1e-5, atol=1e-5), (out_auto, ref)

    # Native-dtype (bf16) path: cast + exp in f32 happen in-kernel, max/select in bf16.
    scores_bf16 = scores.astype(jnp.bfloat16)
    out_bf16 = blend_loss(scores_bf16, labels, weight, row_tile=8)
    jax.block_until_ready(out_bf16)
    ref_bf16 = blend_loss_ref(scores_bf16.astype(jnp.float32), labels, weight)
    assert jnp.allclose(out_bf16, ref_bf16, rtol=1e-4, atol=1e-4), (out_bf16, ref_bf16)

    # Documented edge case: all labels ignored -> 0/0 = NaN, matching torch.
    out_nan = blend_loss(scores, jnp.zeros((N,), jnp.int32), weight, row_tile=8)
    jax.block_until_ready(out_nan)
    assert bool(jnp.all(jnp.isnan(out_nan)))

    print("KERNEL_OK")
</pallas_src>

<mosaic_0001>
module attributes {stable_mosaic.version = 11 : i64} {
  func.func @_blend_loss_kernel(%arg0: i32, %arg1: memref<8x16xf32, #tpu.memory_space<vmem>>, %arg2: memref<8x1xi32, #tpu.memory_space<vmem>>, %arg3: memref<1x8x128xf32, #tpu.memory_space<vmem>>, %arg4: memref<1x8x128xf32, #tpu.memory_space<vmem>>) attributes {dimension_semantics = [#tpu.dimension_semantics<parallel>], iteration_bounds = array<i64: 3>, scalar_prefetch = 0 : i64, scratch_operands = 0 : i64, tpu.core_type = #tpu.core_type<tc>, window_params = [{transform_indices = @transform_0, window_bounds = array<i64: 8, 16>}, {transform_indices = @transform_1, window_bounds = array<i64: 8, 1>}, {transform_indices = @transform_2, window_bounds = array<i64: 1, 8, 128>}, {transform_indices = @transform_3, window_bounds = array<i64: 1, 8, 128>}]} {
    %c0 = arith.constant 0 : index
    %c0_0 = arith.constant 0 : index
    %0 = vector.load %arg1[%c0, %c0_0] : memref<8x16xf32, #tpu.memory_space<vmem>>, vector<8x16xf32>
    %c0_1 = arith.constant 0 : index
    %c0_2 = arith.constant 0 : index
    %1 = vector.load %arg2[%c0_1, %c0_2] : memref<8x1xi32, #tpu.memory_space<vmem>>, vector<8x1xi32>
    %2 = tpu.iota {dimensions = array<i32: 0>} : vector<8x1xi32>
    %c8_i32 = arith.constant 8 : i32
    %3 = arith.muli %arg0, %c8_i32 : i32
    %4 = vector.broadcast %3 : i32 to vector<8x1xi32>
    %5 = arith.addi %4, %2 : vector<8x1xi32>
    %c20_i32 = arith.constant 20 : i32
    %6 = vector.broadcast %c20_i32 : i32 to vector<8x1xi32>
    %7 = arith.cmpi slt, %5, %6 : vector<8x1xi32>
    %cst = arith.constant dense<0xFF800000> : vector<8xf32>
    %8 = vector.multi_reduction <maximumf>, %0, %cst [1] : vector<8x16xf32> to vector<8xf32>
    %9 = vector.shape_cast %8 : vector<8xf32> to vector<8x1xf32>
    %10 = tpu.iota {dimensions = array<i32: 1>} : vector<8x16xi32>
    %11 = vector.broadcast %1 : vector<8x1xi32> to vector<8x16xi32>
    %12 = arith.cmpi eq, %10, %11 : vector<8x16xi32>
    %c0_i32 = arith.constant 0 : i32
    %13 = arith.sitofp %c0_i32 : i32 to f32
    %14 = vector.broadcast %13 : f32 to vector<8x16xf32>
    %15 = arith.select %12, %0, %14 : vector<8x16xi1>, vector<8x16xf32>
    %cst_3 = arith.constant dense<0.000000e+00> : vector<8xf32>
    %16 = vector.multi_reduction <add>, %15, %cst_3 [1] : vector<8x16xf32> to vector<8xf32>
    %17 = vector.shape_cast %16 : vector<8xf32> to vector<8x1xf32>
    %18 = vector.broadcast %9 : vector<8x1xf32> to vector<8x16xf32>
    %19 = arith.subf %0, %18 : vector<8x16xf32>
    %20 = math.exp %19 : vector<8x16xf32>
    %cst_4 = arith.constant dense<0.000000e+00> : vector<8xf32>
    %21 = vector.multi_reduction <add>, %20, %cst_4 [1] : vector<8x16xf32> to vector<8xf32>
    %22 = vector.shape_cast %21 : vector<8xf32> to vector<8x1xf32>
    %23 = math.log %22 : vector<8x1xf32>
    %24 = arith.addf %23, %9 : vector<8x1xf32>
    %c0_i32_5 = arith.constant 0 : i32
    %25 = vector.broadcast %c0_i32_5 : i32 to vector<8x1xi32>
    %26 = arith.cmpi ne, %1, %25 : vector<8x1xi32>
    %27 = arith.andi %26, %7 : vector<8x1xi1>
    %28 = arith.subf %24, %17 : vector<8x1xf32>
    %cst_6 = arith.constant 0.000000e+00 : f32
    %29 = vector.broadcast %cst_6 : f32 to vector<8x1xf32>
    %30 = arith.select %27, %28, %29 : vector<8x1xi1>, vector<8x1xf32>
    %31 = vector.shape_cast %30 : vector<8x1xf32> to vector<1x8x1xf32>
    %cst_7 = arith.constant dense<0.000000e+00> : vector<1xf32>
    %32 = vector.multi_reduction <add>, %31, %cst_7 [1, 2] : vector<1x8x1xf32> to vector<1xf32>
    %33 = vector.shape_cast %32 : vector<1xf32> to vector<1x1x1xf32>
    %34 = vector.extract %33[0, 0, 0] : f32 from vector<1x1x1xf32>
    %35 = arith.extui %27 : vector<8x1xi1> to vector<8x1xi32>
    %36 = arith.sitofp %35 : vector<8x1xi32> to vector<8x1xf32>
    %37 = vector.shape_cast %36 : vector<8x1xf32> to vector<1x8x1xf32>
    %cst_8 = arith.constant dense<0.000000e+00> : vector<1xf32>
    %38 = vector.multi_reduction <add>, %37, %cst_8 [1, 2] : vector<1x8x1xf32> to vector<1xf32>
    %39 = vector.shape_cast %38 : vector<1xf32> to vector<1x1x1xf32>
    %40 = vector.extract %39[0, 0, 0] : f32 from vector<1x1x1xf32>
    %41 = vector.broadcast %34 : f32 to vector<1x8x128xf32>
    %c0_9 = arith.constant 0 : index
    %c0_10 = arith.constant 0 : index
    %c0_11 = arith.constant 0 : index
    %42 = vector.load %arg3[%c0_9, %c0_10, %c0_11] : memref<1x8x128xf32, #tpu.memory_space<vmem>>, vector<1x8x128xf32>
    tpu.vector_store %arg3[%c0_9, %c0_10, %c0_11], %41 {strides = array<i32>} : memref<1x8x128xf32, #tpu.memory_space<vmem>>, vector<1x8x128xf32>,
    %43 = vector.broadcast %40 : f32 to vector<1x8x128xf32>
    %c0_12 = arith.constant 0 : index
    %c0_13 = arith.constant 0 : index
    %c0_14 = arith.constant 0 : index
    %44 = vector.load %arg4[%c0_12, %c0_13, %c0_14] : memref<1x8x128xf32, #tpu.memory_space<vmem>>, vector<1x8x128xf32>
    tpu.vector_store %arg4[%c0_12, %c0_13, %c0_14], %43 {strides = array<i32>} : memref<1x8x128xf32, #tpu.memory_space<vmem>>, vector<1x8x128xf32>,
    return
  }
  func.func @transform_0(%arg0: i32) -> (i32, i32) {
    %c0_i32 = arith.constant 0 : i32
    %c0_i32_0 = arith.constant 0 : i32
    return %arg0, %c0_i32 : i32, i32
  }
  func.func @transform_1(%arg0: i32) -> (i32, i32) {
    %c0_i32 = arith.constant 0 : i32
    %c0_i32_0 = arith.constant 0 : i32
    return %arg0, %c0_i32 : i32, i32
  }
  func.func @transform_2(%arg0: i32) -> (i32, i32, i32) {
    %c0_i32 = arith.constant 0 : i32
    %c0_i32_0 = arith.constant 0 : i32
    %c0_i32_1 = arith.constant 0 : i32
    return %arg0, %c0_i32, %c0_i32_0 : i32, i32, i32
  }
  func.func @transform_3(%arg0: i32) -> (i32, i32, i32) {
    %c0_i32 = arith.constant 0 : i32
    %c0_i32_0 = arith.constant 0 : i32
    %c0_i32_1 = arith.constant 0 : i32
    return %arg0, %c0_i32, %c0_i32_0 : i32, i32, i32
  }
}

</mosaic_0001>

<bundles_post_ra>
// kernel: tpu_custom_call.1
= control target key start
LH: loop header
LB: loop body
LE: loop exit
PB: predicated region body
PF: predicated region fallthrough
CT: control target
= control target key end

     0   :  { %9 = vsyncpa [#allocation3], 0  ;;  %s698_s0 = inlined_call_operand.vmem [shape: f32[20,16], index: 0, kind: input, shape index: {}]   ;;  %s699_s1 = inlined_call_operand.vmem [shape: s32[20,1], index: 1, kind: input, shape index: {}]   ;;  %s700_s2 = inlined_call_operand.hbm [shape: f32[3,8,128], index: 2, kind: output, shape index: {0}]   ;;  %s701_s3 = inlined_call_operand.hbm [shape: f32[3,8,128], index: 3, kind: output, shape index: {1}]  }
   0x1   :  { %11 = vsyncpa [#allocation3 + $0x1], 0 }
   0x2   :  { %12 = vsyncpa [#allocation5], 0 }
   0x3   :  { %14 = vsyncpa [#allocation5 + $0x1], 0  ;;  %s584_s12 = smov 0   ;;  %s586_s13 = smov 0  }
   0x4   :  { %s588_s14 = smov 0   ;;  %s590_s15 = smov 0  }
   0x5 LB: > { %s605_s16 = sadd.s32 4294967295, %s560_s15   ;;  %s395_s17 = sadd.s32 4294967294, %s560_s15   ;;  %s560_s15 = sphi %s590_s15, %s707_s15   ;;  %s556_s14 = sphi %s588_s14, %s706_s14   ;;  %s552_s13 = sphi %s586_s13, %s705_s13   ;;  %s548_s12 = sphi %s584_s12, %s704_s12  }
   0x6   : > { %s609_s18 = sadd.s32 1, %s560_s15   ;;  %s79_s19 = sadd.s32 1, %s556_s14 }
   0x7   : > { %s76_s20 = ssub.s32 %s560_s15, %s609_s18  ;;  %p89_p0 = scmp.ne.s32.totalorder %s556_s14, %s552_s13 }
   0x8   : > { %p77_p1 = scmp.eq.s32.totalorder %s76_s20, 0  ;;  %p90_p2 = scmp.eq.s32.totalorder %s605_s16, 2 }
   0x9   : > { %p95_p3 = scmp.ne.s32.totalorder %s552_s13, %s548_s12  ;;  %p96_p4 = scmp.eq.s32.totalorder %s395_s17, 2 }
   0xa   : > { %s620_s21 = scalar_select %p77_p1, %s556_s14, %s79_s19  }
   0xb   : > { %p622_p5 = por %p90_p2, %p89_p0  ;;  %p626_p6 = por %p96_p4, %p95_p3 }
   0xc   : > { %p398_p7 = scmp.ge.s32.totalorder %s560_s15, 1  ;;  %p154_p8 = scmp.lt.s32.totalorder %s560_s15, 4 }
   0xe   : > { %p155_p9 = pnand %p398_p7, %p154_p8 }
   0xf   : > { %p186_p10 = scmp.lt.s32.totalorder (!%p155_p9), %s605_s16, 2  ;;  %s644_s5 = sshll.u32 (!%p155_p9), %s605_s16, 3 }
  0x10   : > { %158 = sbr.rel (%p155_p9) target bundleno = 482 (0x1e2), region = 28  ;;  %s648_s6 = sand.u32 (!%p155_p9), 1, %s552_s13  }
  0x11   : > { %s399_s7 = sshll.u32 (!%p155_p9), %s648_s6, 3  ;;  %s272_s10 = scalar_lea.hbm (!%p155_p9), %s700_s2, %s644_s5 }
  0x12   : > { %s178_s11 = scalar_lea.vmem (!%p155_p9), [#allocation2], %s399_s7  ;;  %s276_s17 = sshll.u32 (!%p155_p9), %s272_s10, 4  ;;  %s277_s17 = int_to_ptr.hbm [resolvable:$true] %s276_s17 }
  0x13   : > { %s257_s26 = scalar_lea.sflag (!%p155_p9), [#allocation3], %s648_s6  ;;  %s480_s27 = sshra.s32 (!%p155_p9), %s277_s17, 4  ;;  %s481_s27 = int_to_ptr.hbm [resolvable:$true] %s480_s27 }
  0x14   : > { %p487_p0 = scmp.lt.s32.totalorder (!%p155_p9), %s481_s27, %s700_s2 }
  0x15   : > { %v562_v0 = vmov 0   ;;  %s187_s24 = scalar_select %p186_p10, %s605_s16, 2  ;;  %vm202_vm0 = vcmask 130048   ;;  %v196_v9 = vlaneseq  ;;  %v199_v16 = vstv %s644_s5 }
  0x16   : > { %461 = vset.pattern.permute.xlu0 %v562_v0  ;;  %vm229_vm5 = vcmask 7168   ;;  %v563_v25 = vmov 0.0   ;;  %s274_s16 = sshll.u32 %s178_s11, 4  ;;  %s275_s16 = int_to_ptr.vmem [resolvable:$true] %s274_s16 }
  0x17   : > { %s401_s25 = sshll.u32 %s187_s24, 3  ;;  %v207_v10 = vand.u32 127, %v196_v9  ;;  %v197_v15 = vshrl.u32 %v196_v9, 7 }
  0x18   : > { %s189_s28 = scalar_lea.vmem %s698_s0, %s401_s25  ;;  %s193_s4 = scalar_lea.vmem %s699_s1, %s401_s25 }
  0x19   : > { %v194_v1 = vld [vmem:[%s189_s28] sm:$0xff]  ;;  %v200_v17 = vadd.s32 %v199_v16, %v197_v15  ;;  %s286_s25 = scalar_lea.hbm %s701_s3, %s644_s5  ;;  %s482_s28 = scalar_lea.hbm %s481_s27, 8 }
  0x1a   : > { %v203_v2 = vsel %vm202_vm0, %v194_v1, -inf  ;;  %v195_v3 = vld [vmem:[%s193_s4] sm:$0xff]  ;;  %p483_p11 = scmp.ne.s32.totalorder %s481_s27, %s482_s28  ;;  %s486_s4 = scalar_lea.hbm %s700_s2, 24 }
  0x1b   : > { %204 = vmax.xlane.f32.xlu0 %v203_v2  ;;  %vm201_vm2 = vcmp.lt.s32.totalorder %v200_v17, 20  ;;  %vm225_vm3 = vcmp.ne.s32.totalorder %v195_v3, 0  ;;  %p488_p1 = scmp.lt.s32.totalorder %s486_s4, %s482_s28 }
  0x1c   : > { %vm226_vm4 = vmand %vm225_vm3, %vm201_vm2  ;;  %p484_p12 = pnand %p483_p11, %p622_p5 }
  0x1d   : > { %v404_v26 = vsel %vm226_vm4, 1.0, %v563_v25  ;;  %p489_p2 = por %p488_p1, %p487_p0 }
  0x1e   : > { %v242_v27 = vsel %vm229_vm5, %v404_v26, 0.0  ;;  %p485_p13 = pneg %p484_p12 }
  0x20   : > { %p490_p3 = pnand %p489_p2, %p485_p13 }
  0x2f   : > { %209 = vperm.xlu0 %461, %v195_v3  }
  0x8e   : > { %v205_v4 = vpop.xlane.xlu0 %204 }
  0x8f   : > { %v216_v5 = vsub.f32 %v194_v1, %v205_v4 }
  0x91   : > { %v217_v6 = vmul.f32 1.442695, %v216_v5 }
  0x93   : > { %462 = vpow2.f32 %v217_v6 }
  0x99   : > { %v463_v7 = vpop.eup %462 }
  0x9a   : > { %v219_v8 = vsel %vm202_vm0, %v463_v7, 0.0 }
  0x9b   : > { %220 = vadd.xlane.f32.xlu1 %v219_v8 }
  0xa1   : > { %v210_v11 = vpop.permute.xlu0 %209 }
  0xa2   : > { %vm211_vm1 = vcmp.eq.s32.totalorder %v207_v10, %v210_v11 }
  0xa3   : > { %v212_v12 = vsel %vm211_vm1, %v194_v1, 0.0 }
  0xa4   : > { %v213_v13 = vsel %vm202_vm0, %v212_v12, 0.0 }
  0xa5   : > { %214 = vadd.xlane.f32.xlu1 %v213_v13 }
 0x10e   : > { %v221_v14 = vpop.xlane.xlu1 %220 }
 0x10f   : > { %464 = vlog2.f32 %v221_v14 }
 0x115   : > { %v465_v18 = vpop.eup %464 }
 0x116   : > { %v223_v19 = vmul.f32 0.6931472, %v465_v18 }
 0x118   : > { %v224_v20 = vadd.f32 %v223_v19, %v205_v4  ;;  %v215_v21 = vpop.xlane.xlu1 %214 }
 0x11a   : > { %v227_v22 = vsub.f32 %v224_v20, %v215_v21 }
 0x11c   : > { %v228_v23 = vsel %vm226_vm4, %v227_v22, 0.0 }
 0x11d   : > { %v230_v24 = vsel %vm229_vm5, %v228_v23, 0.0 }
 0x11e   : > { %231 = vadd.xlane.f32.xlu2 %v230_v24 }
 0x126   : > { %243 = vadd.xlane.f32.xlu2 %v242_v27 }
 0x191   : > { %v232_v28 = vpop.xlane.xlu2 %231 }
 0x192   : > { %v233_v29 = vrot.slane %v232_v28, 4 }
 0x194   : > { %v234_v30 = vadd.f32 %v233_v29, %v232_v28 }
 0x196   : > { %v235_v31 = vrot.slane %v234_v30, 2 }
 0x198   : > { %v236_v32 = vadd.f32 %v235_v31, %v234_v30 }
 0x199   : > { %v244_v33 = vpop.xlane.xlu2 %243 }
 0x19a   : > { %v245_v34 = vrot.slane %v244_v33, 4  ;;  %v237_v35 = vrot.slane %v236_v32, 1 }
 0x19c   : > { %v246_v36 = vadd.f32 %v245_v34, %v244_v33  ;;  %v238_v37 = vadd.f32 %v237_v35, %v236_v32 }
 0x19e   : > { %v247_v38 = vrot.slane %v246_v36, 2  ;;  %411 = vpush %v238_v37 }
 0x1a0   : > { %v248_v39 = vadd.f32 %v247_v38, %v246_v36 }
 0x1a2   : > { %v249_v40 = vrot.slane %v248_v39, 1 }
 0x1a4   : > { %v250_v41 = vadd.f32 %v249_v40, %v248_v39 }
 0x1a6   : > { %413 = vpush %v250_v41 }
 0x1cf   : > { %s412_s19 = spop %411 }
 0x1d0   : > { %v252_v42 = vstv %s412_s19 }
 0x1d1   : > { %253 = vst [vmem:[%s178_s11] sm:$0xff] %v252_v42 }
 0x1d2   : > { %493 = shalt.err (!%p490_p3)
}
 0x1d3   : > { %415 = dma.vmem_to_hbm [thread:$0]  (%p622_p5), %s275_s16, 128, %s277_s17, %s257_s26  }
 0x1d4   : > { %s185_s5 = scalar_lea.vmem [#allocation4], %s399_s7  ;;  %s290_s11 = sshll.u32 %s286_s25, 4  ;;  %s291_s11 = int_to_ptr.hbm [resolvable:$true] %s290_s11 }
 0x1d5   : > { %s288_s10 = sshll.u32 %s185_s5, 4  ;;  %s262_s20 = scalar_lea.sflag [#allocation5], %s648_s6  ;;  %s289_s10 = int_to_ptr.vmem [resolvable:$true] %s288_s10 }
 0x1d6   : > { %s508_s24 = sshra.s32 %s291_s11, 4  ;;  %s514_s16 = scalar_lea.hbm %s701_s3, 24  ;;  %s509_s24 = int_to_ptr.hbm [resolvable:$true] %s508_s24 }
 0x1d7   : > { %s414_s19 = spop %413  ;;  %s510_s27 = scalar_lea.hbm %s509_s24, 8 }
 0x1d8   : > { %v254_v43 = vstv %s414_s19  ;;  %p511_p4 = scmp.ne.s32.totalorder %s509_s24, %s510_s27  ;;  %p515_p9 = scmp.lt.s32.totalorder %s509_s24, %s701_s3 }
 0x1d9   : > { %255 = vst [vmem:[%s185_s5] sm:$0xff] %v254_v43  ;;  %p516_p10 = scmp.lt.s32.totalorder %s514_s16, %s510_s27 }
 0x1da   : > { %p512_p7 = pnand %p511_p4, %p622_p5 }
 0x1db   : > { %p517_p11 = por %p516_p10, %p515_p9 }
 0x1dc   : > { %p513_p8 = pneg %p512_p7 }
 0x1de   : > { %p518_p12 = pnand %p517_p11, %p513_p8 }
 0x1e0   : > { %521 = shalt.err (!%p518_p12)
}
 0x1e1   : > { %416 = dma.vmem_to_hbm [thread:$0]  (%p622_p5), %s289_s10, 128, %s291_s11, %s262_s20  }
 0x1e2 PF: > { %p426_p13 = scmp.ge.s32.totalorder %s560_s15, 2  ;;  %s302_s6 = sand.u32 1, %s548_s12  }
 0x1e3   : > { %s303_s25 = scalar_lea.sflag [#allocation3], %s302_s6 }
 0x1e4   : > { %p420_p0 = pnand %p426_p13, %p626_p6 }
 0x1e6   : > { %p421_p1 = pneg %p420_p0 }
 0x1e8   : > { %539 = dma.done.wait (%p421_p1), %s303_s25, 128  }
 0x1e9   : > { %541 = vsyncadd (%p421_p1), %s303_s25, 4294967168  ;;  %s313_s26 = scalar_lea.sflag [#allocation5], %s302_s6 }
 0x1ea   : > { %543 = dma.done.wait (%p421_p1), %s313_s26, 128  }
 0x1eb   : > { %545 = vsyncadd (%p421_p1), %s313_s26, 4294967168  ;;  %p17_p5 = scmp.ge.s32.totalorder %s609_s18, 5   ;;  %s704_s12 = smov %s552_s13 }
 0x1ec   : > { %s705_s13 = smov %s556_s14  ;;  %s706_s14 = smov %s620_s21 }
 0x1ed   : > { %s707_s15 = smov %s609_s18  ;;  %19 = sbr.rel (!%p17_p5) target bundleno = 5 (0x5), region = 83 }
 0x1f2   :  { %319 = vsyncpa [#allocation3], 1 }
 0x1f3   :  { %321 = vsyncpa [#allocation3 + $0x1], 1 }
 0x1f4   :  { %322 = vsyncpa [#allocation5], 1 }
 0x1f5   :  { %324 = vsyncpa [#allocation5 + $0x1], 1 }

</bundles_post_ra>
